<compile_context>
chip_gen: v7x
topology: tpu7x:2x2x1
jax: 0.10.0
libtpu: 0.0.40
codegen_flags: <defaults>
</compile_context>

<pallas_src>
import functools

import jax
import jax.numpy as jnp
from jax.experimental import pallas as pl
from jax.experimental.pallas import tpu as pltpu


_GATE_PAD = 128  # per-gate column width (lane-aligned) in the packed weights


# ----------------------------- fused kernel ---------------------------------


def _fused_gru_kernel(*refs, num_layers, hidden_size):
    """All GRU layers + final Linear in one kernel body (everything in VMEM)."""
    L, H, GP = num_layers, hidden_size, _GATE_PAD

    x_ref, hs_ref = refs[0], refs[1]
    wx_refs = [refs[2 + 2 * l] for l in range(L)]        # (In_l, 3*GP)
    bin_refs = [refs[3 + 2 * l] for l in range(L)]       # (1, H)
    wh_bd_ref = refs[2 + 2 * L]                          # (L*H + 1, L*3*GP)
    w_lin_ref = refs[3 + 2 * L]                          # (1, H)
    b_lin_ref = refs[4 + 2 * L]                          # (1, 1)
    out_ref = refs[5 + 2 * L]                            # (B, 1)
    hs_out_ref = refs[6 + 2 * L]                         # (L, B, H), aliased

    f32 = jnp.float32

    # Read every incoming hidden state before any aliased write to hs_out_ref.
    hs_old = [hs_ref[l].astype(f32) for l in range(L)]
    B = hs_old[0].shape[0]

    # ---- hoisted h-path: ONE block-diagonal matmul covers every layer's
    # h @ [Wh_r | Wh_z | Wh_n]; the folded biases live in the ones row. ------
    hcat = jnp.concatenate(hs_old + [jnp.ones((B, 1), f32)], axis=1)
    gh = jnp.dot(hcat, wh_bd_ref[...], preferred_element_type=f32)  # (B, L*3*GP)

    inp = x_ref[...].astype(f32)
    for l in range(L):  # unrolled at trace time; only the x-path is serial
        gx = jnp.dot(inp, wx_refs[l][...], preferred_element_type=f32)  # (B, 3*GP)
        c0 = 3 * GP * l
        # All slice starts are multiples of 128 -> vreg-aligned, free.
        r = jax.nn.sigmoid(gx[:, 0:H] + gh[:, c0:c0 + H])
        z = jax.nn.sigmoid(gx[:, GP:GP + H] + gh[:, c0 + GP:c0 + GP + H])
        n = jnp.tanh(gx[:, 2 * GP:2 * GP + H] + bin_refs[l][...]
                     + r * gh[:, c0 + 2 * GP:c0 + 2 * GP + H])

        h_new = n + z * (hs_old[l] - n)        # == (1 - z) * n + z * h
        hs_out_ref[l] = h_new.astype(hs_out_ref.dtype)

        # Dropout(p=0.0) == identity feeds the next layer.
        # TODO(synk): stochastic dropout (p > 0, training mode) not implemented.
        inp = h_new

    # Final Linear(H, 1): VPU multiply + XLU lane reduction (no MXU N=1 push).
    out = jnp.sum(inp * w_lin_ref[...], axis=-1, keepdims=True) + b_lin_ref[...]
    out_ref[...] = out.astype(out_ref.dtype)


# ----------------------------- wrapper ---------------------------------------


def _vmem_spec():
    return pl.BlockSpec(memory_space=pltpu.MemorySpace.VMEM)


@jax.jit
def gru_multilayer_cell_forward(kernel_params, x, hs_stacked):
    """Mirrors GRU_multilayer_cell.forward with a single fused pallas_call.

    kernel_params: dict with
      'wx'    : list of per-layer packed input->gate weights (In_l, 3*128)
      'b_in'  : list of per-layer input n-gate biases (1, H)
      'wh_bd' : block-diagonal hidden->gate weight (L*H + 1, L*3*128),
                last row = folded biases (r: b_ir+b_hr, z: b_iz+b_hz, n: b_hn)
      'linear': (w_lin_row (1, H), b_lin (1, 1))
    x:          (B, input_size)
    hs_stacked: (num_layers, B, hidden_size)
    Returns (out (B, 1), new hs_stacked (num_layers, B, hidden_size)).
    """
    L, B, H = hs_stacked.shape

    flat_inputs = [x, hs_stacked]
    for wx, b_in in zip(kernel_params["wx"], kernel_params["b_in"]):
        flat_inputs.extend((wx, b_in))
    flat_inputs.append(kernel_params["wh_bd"])
    flat_inputs.extend(kernel_params["linear"])
    n_in = len(flat_inputs)

    kernel = functools.partial(_fused_gru_kernel, num_layers=L, hidden_size=H)
    out, hs_new = pl.pallas_call(
        kernel,
        out_shape=(jax.ShapeDtypeStruct((B, 1), jnp.float32),
                   jax.ShapeDtypeStruct((L, B, H), jnp.float32)),
        in_specs=[_vmem_spec()] * n_in,
        out_specs=(_vmem_spec(), _vmem_spec()),
        # hs (input idx 1) updates in place into the stacked hs output (idx 1).
        input_output_aliases={1: 1},
    )(*flat_inputs)
    return out, hs_new


# ----------------------------- param init / prep -----------------------------


def init_params(key, input_size, hidden_size, num_layers):
    """PyTorch-style uniform(-1/sqrt(H), 1/sqrt(H)) init, deterministic.

    Weights stored pre-transposed: w_ih (in_feats, 3H), w_hh (H, 3H),
    biases (1, 3H); gate order r, z, n along the 3H axis.
    """
    bound = 1.0 / float(hidden_size) ** 0.5

    def u(k, shape):
        return jax.random.uniform(k, shape, jnp.float32, -bound, bound)

    cells = []
    in_feats = input_size
    for _ in range(num_layers):
        key, k1, k2, k3, k4 = jax.random.split(key, 5)
        w_ih = u(k1, (in_feats, 3 * hidden_size))
        w_hh = u(k2, (hidden_size, 3 * hidden_size))
        b_ih = u(k3, (1, 3 * hidden_size))
        b_hh = u(k4, (1, 3 * hidden_size))
        cells.append((w_ih, w_hh, b_ih, b_hh))
        in_feats = hidden_size

    key, k1, k2 = jax.random.split(key, 3)
    w_lin = jax.random.uniform(k1, (hidden_size, 1), jnp.float32, -bound, bound)
    b_lin = jax.random.uniform(k2, (1, 1), jnp.float32, -bound, bound)
    return {"cells": cells, "linear": (w_lin, b_lin)}


def prepare_kernel_params(params, hidden_size):
    """Host-side, one-time repacking of weights for the fused kernel.

    * Per layer: input->gate weights packed into (In_l, 3*128) with gate blocks
      at lane offsets 0 / 128 / 256 (zero padding elsewhere).
    * All hidden->gate weights packed into one block-diagonal (L*H+1, L*3*128)
      matrix; the last (ones) row carries the folded r/z biases and b_hn.
    * b_in (outside the r*(.) term) stays a separate (1, H) per-layer bias.
    """
    H, GP = hidden_size, _GATE_PAD
    cells = params["cells"]
    L = len(cells)

    wx_list, b_in_list = [], []
    wh_bd = jnp.zeros((L * H + 1, L * 3 * GP), jnp.float32)

    for l, (w_ih, w_hh, b_ih, b_hh) in enumerate(cells):
        in_feats = w_ih.shape[0]
        wi_r, wi_z, wi_n = w_ih[:, :H], w_ih[:, H:2 * H], w_ih[:, 2 * H:]
        wh_r, wh_z, wh_n = w_hh[:, :H], w_hh[:, H:2 * H], w_hh[:, 2 * H:]
        b_r = b_ih[0, :H] + b_hh[0, :H]            # folded r bias
        b_z = b_ih[0, H:2 * H] + b_hh[0, H:2 * H]  # folded z bias
        b_in = b_ih[:, 2 * H:]                     # stays outside r*(.)
        b_hn = b_hh[0, 2 * H:]                     # inside r*(.): folds into h path

        wx = jnp.zeros((in_feats, 3 * GP), jnp.float32)
        wx = wx.at[:, 0:H].set(wi_r)
        wx = wx.at[:, GP:GP + H].set(wi_z)
        wx = wx.at[:, 2 * GP:2 * GP + H].set(wi_n)
        wx_list.append(wx)
        b_in_list.append(b_in)

        r0, c0 = l * H, l * 3 * GP
        wh_bd = wh_bd.at[r0:r0 + H, c0:c0 + H].set(wh_r)
        wh_bd = wh_bd.at[r0:r0 + H, c0 + GP:c0 + GP + H].set(wh_z)
        wh_bd = wh_bd.at[r0:r0 + H, c0 + 2 * GP:c0 + 2 * GP + H].set(wh_n)
        wh_bd = wh_bd.at[L * H, c0:c0 + H].set(b_r)
        wh_bd = wh_bd.at[L * H, c0 + GP:c0 + GP + H].set(b_z)
        wh_bd = wh_bd.at[L * H, c0 + 2 * GP:c0 + 2 * GP + H].set(b_hn)

    w_lin, b_lin = params["linear"]
    return {"wx": wx_list, "b_in": b_in_list, "wh_bd": wh_bd,
            "linear": (w_lin.T, b_lin)}  # w_lin.T: (1, H) row for VPU reduce


# ----------------------------- reference (pure JAX) --------------------------


def _gru_cell_ref(x, h, w_ih, w_hh, b_ih, b_hh):
    gi = x @ w_ih + b_ih
    gh = h @ w_hh + b_hh
    H = h.shape[1]
    r = jax.nn.sigmoid(gi[:, :H] + gh[:, :H])
    z = jax.nn.sigmoid(gi[:, H:2 * H] + gh[:, H:2 * H])
    n = jnp.tanh(gi[:, 2 * H:] + r * gh[:, 2 * H:])
    return (1.0 - z) * n + z * h


def _forward_ref(params, x, hs):
    hs = list(hs)
    num_layers = len(params["cells"])
    hs[0] = _gru_cell_ref(x, hs[0], *params["cells"][0])
    if num_layers > 1:
        for i in range(num_layers - 1):
            hs[i + 1] = _gru_cell_ref(hs[i], hs[i + 1], *params["cells"][i + 1])
        out = hs[num_layers - 1] @ params["linear"][0] + params["linear"][1]
    else:
        out = hs[0] @ params["linear"][0] + params["linear"][1]
    return out, hs


# ----------------------------- main ------------------------------------------


if __name__ == "__main__":
    batch_size = 2
    input_size = 16
    hidden_size = 32
    num_layers = 3

    key = jax.random.PRNGKey(0)
    key, kx, kh = jax.random.split(key, 3)

    params = init_params(key, input_size, hidden_size, num_layers)
    kparams = prepare_kernel_params(params, hidden_size)

    x = jax.random.normal(kx, (batch_size, input_size), jnp.float32)
    hkeys = jax.random.split(kh, num_layers)
    hs = [jax.random.normal(hkeys[i], (batch_size, hidden_size), jnp.float32)
          for i in range(num_layers)]
    hs_stacked = jnp.stack(hs, axis=0)

    # Pure-JAX reference (computed on the original PyTorch-layout params).
    out_ref_val, hs_ref_val = _forward_ref(params, x, hs)

    out, hs_new = gru_multilayer_cell_forward(kparams, x, hs_stacked)
    out = jax.block_until_ready(out)
    hs_new = jax.block_until_ready(hs_new)

    assert jnp.allclose(out, out_ref_val, atol=1e-4, rtol=1e-4), \
        float(jnp.max(jnp.abs(out - out_ref_val)))
    for l in range(num_layers):
        assert jnp.allclose(hs_new[l], hs_ref_val[l], atol=1e-4, rtol=1e-4), \
            (l, float(jnp.max(jnp.abs(hs_new[l] - hs_ref_val[l]))))

    print("KERNEL_OK")
</pallas_src>

<mosaic_0001>
module attributes {stable_mosaic.version = 11 : i64} {
  func.func @_fused_gru_kernel(%arg0: memref<2x16xf32, #tpu.memory_space<vmem>>, %arg1: memref<3x2x32xf32, #tpu.memory_space<vmem>>, %arg2: memref<16x384xf32, #tpu.memory_space<vmem>>, %arg3: memref<1x32xf32, #tpu.memory_space<vmem>>, %arg4: memref<32x384xf32, #tpu.memory_space<vmem>>, %arg5: memref<1x32xf32, #tpu.memory_space<vmem>>, %arg6: memref<32x384xf32, #tpu.memory_space<vmem>>, %arg7: memref<1x32xf32, #tpu.memory_space<vmem>>, %arg8: memref<97x1152xf32, #tpu.memory_space<vmem>>, %arg9: memref<1x32xf32, #tpu.memory_space<vmem>>, %arg10: memref<1x1xf32, #tpu.memory_space<vmem>>, %arg11: memref<2x1xf32, #tpu.memory_space<vmem>>, %arg12: memref<3x2x32xf32, #tpu.memory_space<vmem>>) attributes {dimension_semantics = [], scalar_prefetch = 0 : i64, scratch_operands = 0 : i64, tpu.core_type = #tpu.core_type<tc>} {
    %c0 = arith.constant 0 : index
    %c0_0 = arith.constant 0 : index
    %c0_1 = arith.constant 0 : index
    %0 = vector.load %arg1[%c0, %c0_0, %c0_1] : memref<3x2x32xf32, #tpu.memory_space<vmem>>, vector<1x2x32xf32>
    %1 = vector.shape_cast %0 : vector<1x2x32xf32> to vector<2x32xf32>
    %c1 = arith.constant 1 : index
    %c0_2 = arith.constant 0 : index
    %c0_3 = arith.constant 0 : index
    %2 = vector.load %arg1[%c1, %c0_2, %c0_3] : memref<3x2x32xf32, #tpu.memory_space<vmem>>, vector<1x2x32xf32>
    %3 = vector.shape_cast %2 : vector<1x2x32xf32> to vector<2x32xf32>
    %c2 = arith.constant 2 : index
    %c0_4 = arith.constant 0 : index
    %c0_5 = arith.constant 0 : index
    %4 = vector.load %arg1[%c2, %c0_4, %c0_5] : memref<3x2x32xf32, #tpu.memory_space<vmem>>, vector<1x2x32xf32>
    %5 = vector.shape_cast %4 : vector<1x2x32xf32> to vector<2x32xf32>
    %cst = arith.constant 1.000000e+00 : f32
    %6 = vector.broadcast %cst : f32 to vector<2x1xf32>
    %7 = tpu.concatenate %1, %3, %5, %6 in 1 : vector<2x32xf32>, vector<2x32xf32>, vector<2x32xf32>, vector<2x1xf32> -> vector<2x97xf32>
    %c0_6 = arith.constant 0 : index
    %c0_7 = arith.constant 0 : index
    %8 = vector.load %arg8[%c0_6, %c0_7] : memref<97x1152xf32, #tpu.memory_space<vmem>>, vector<97x1152xf32>
    %cst_8 = arith.constant dense<0.000000e+00> : vector<2x1152xf32>
    %9 = tpu.matmul %7, %8, %cst_8 {dimension_numbers = #tpu.dot_dimension_numbers<[1], [0], [0], [1], [0, 0, 1, 1], [], []>} : vector<2x97xf32>, vector<97x1152xf32>, vector<2x1152xf32> -> vector<2x1152xf32>
    %c0_9 = arith.constant 0 : index
    %c0_10 = arith.constant 0 : index
    %10 = vector.load %arg0[%c0_9, %c0_10] : memref<2x16xf32, #tpu.memory_space<vmem>>, vector<2x16xf32>
    %c0_11 = arith.constant 0 : index
    %c0_12 = arith.constant 0 : index
    %11 = vector.load %arg2[%c0_11, %c0_12] : memref<16x384xf32, #tpu.memory_space<vmem>>, vector<16x384xf32>
    %cst_13 = arith.constant dense<0.000000e+00> : vector<2x384xf32>
    %12 = tpu.matmul %10, %11, %cst_13 {dimension_numbers = #tpu.dot_dimension_numbers<[1], [0], [0], [1], [0, 0, 1, 1], [], []>} : vector<2x16xf32>, vector<16x384xf32>, vector<2x384xf32> -> vector<2x384xf32>
    %13 = vector.extract_strided_slice %12 {offsets = [0, 0], sizes = [2, 32], strides = [1, 1]} : vector<2x384xf32> to vector<2x32xf32>
    %14 = vector.extract_strided_slice %9 {offsets = [0, 0], sizes = [2, 32], strides = [1, 1]} : vector<2x1152xf32> to vector<2x32xf32>
    %15 = arith.addf %13, %14 : vector<2x32xf32>
    %16 = arith.negf %15 : vector<2x32xf32>
    %17 = math.exp %16 : vector<2x32xf32>
    %cst_14 = arith.constant 1.000000e+00 : f32
    %18 = vector.broadcast %cst_14 : f32 to vector<2x32xf32>
    %19 = arith.addf %18, %17 : vector<2x32xf32>
    %20 = arith.divf %18, %19 : vector<2x32xf32>
    %21 = vector.extract_strided_slice %12 {offsets = [0, 128], sizes = [2, 32], strides = [1, 1]} : vector<2x384xf32> to vector<2x32xf32>
    %22 = vector.extract_strided_slice %9 {offsets = [0, 128], sizes = [2, 32], strides = [1, 1]} : vector<2x1152xf32> to vector<2x32xf32>
    %23 = arith.addf %21, %22 : vector<2x32xf32>
    %24 = arith.negf %23 : vector<2x32xf32>
    %25 = math.exp %24 : vector<2x32xf32>
    %cst_15 = arith.constant 1.000000e+00 : f32
    %26 = vector.broadcast %cst_15 : f32 to vector<2x32xf32>
    %27 = arith.addf %26, %25 : vector<2x32xf32>
    %28 = arith.divf %26, %27 : vector<2x32xf32>
    %29 = vector.extract_strided_slice %12 {offsets = [0, 256], sizes = [2, 32], strides = [1, 1]} : vector<2x384xf32> to vector<2x32xf32>
    %c0_16 = arith.constant 0 : index
    %c0_17 = arith.constant 0 : index
    %30 = vector.load %arg3[%c0_16, %c0_17] : memref<1x32xf32, #tpu.memory_space<vmem>>, vector<1x32xf32>
    %31 = vector.broadcast %30 : vector<1x32xf32> to vector<2x32xf32>
    %32 = arith.addf %29, %31 : vector<2x32xf32>
    %33 = vector.extract_strided_slice %9 {offsets = [0, 256], sizes = [2, 32], strides = [1, 1]} : vector<2x1152xf32> to vector<2x32xf32>
    %34 = arith.mulf %20, %33 : vector<2x32xf32>
    %35 = arith.addf %32, %34 : vector<2x32xf32>
    %36 = math.tanh %35 : vector<2x32xf32>
    %37 = arith.subf %1, %36 : vector<2x32xf32>
    %38 = arith.mulf %28, %37 : vector<2x32xf32>
    %39 = arith.addf %36, %38 : vector<2x32xf32>
    %c0_18 = arith.constant 0 : index
    %c0_19 = arith.constant 0 : index
    %c0_20 = arith.constant 0 : index
    %40 = vector.load %arg12[%c0_18, %c0_19, %c0_20] : memref<3x2x32xf32, #tpu.memory_space<vmem>>, vector<1x2x32xf32>
    %41 = vector.shape_cast %40 : vector<1x2x32xf32> to vector<2x32xf32>
    %42 = vector.shape_cast %39 : vector<2x32xf32> to vector<1x2x32xf32>
    tpu.vector_store %arg12[%c0_18, %c0_19, %c0_20], %42 {strides = array<i32>} : memref<3x2x32xf32, #tpu.memory_space<vmem>>, vector<1x2x32xf32>,
    %c0_21 = arith.constant 0 : index
    %c0_22 = arith.constant 0 : index
    %43 = vector.load %arg4[%c0_21, %c0_22] : memref<32x384xf32, #tpu.memory_space<vmem>>, vector<32x384xf32>
    %cst_23 = arith.constant dense<0.000000e+00> : vector<2x384xf32>
    %44 = tpu.matmul %39, %43, %cst_23 {dimension_numbers = #tpu.dot_dimension_numbers<[1], [0], [0], [1], [0, 0, 1, 1], [], []>} : vector<2x32xf32>, vector<32x384xf32>, vector<2x384xf32> -> vector<2x384xf32>
    %45 = vector.extract_strided_slice %44 {offsets = [0, 0], sizes = [2, 32], strides = [1, 1]} : vector<2x384xf32> to vector<2x32xf32>
    %46 = vector.extract_strided_slice %9 {offsets = [0, 384], sizes = [2, 32], strides = [1, 1]} : vector<2x1152xf32> to vector<2x32xf32>
    %47 = arith.addf %45, %46 : vector<2x32xf32>
    %48 = arith.negf %47 : vector<2x32xf32>
    %49 = math.exp %48 : vector<2x32xf32>
    %cst_24 = arith.constant 1.000000e+00 : f32
    %50 = vector.broadcast %cst_24 : f32 to vector<2x32xf32>
    %51 = arith.addf %50, %49 : vector<2x32xf32>
    %52 = arith.divf %50, %51 : vector<2x32xf32>
    %53 = vector.extract_strided_slice %44 {offsets = [0, 128], sizes = [2, 32], strides = [1, 1]} : vector<2x384xf32> to vector<2x32xf32>
    %54 = vector.extract_strided_slice %9 {offsets = [0, 512], sizes = [2, 32], strides = [1, 1]} : vector<2x1152xf32> to vector<2x32xf32>
    %55 = arith.addf %53, %54 : vector<2x32xf32>
    %56 = arith.negf %55 : vector<2x32xf32>
    %57 = math.exp %56 : vector<2x32xf32>
    %cst_25 = arith.constant 1.000000e+00 : f32
    %58 = vector.broadcast %cst_25 : f32 to vector<2x32xf32>
    %59 = arith.addf %58, %57 : vector<2x32xf32>
    %60 = arith.divf %58, %59 : vector<2x32xf32>
    %61 = vector.extract_strided_slice %44 {offsets = [0, 256], sizes = [2, 32], strides = [1, 1]} : vector<2x384xf32> to vector<2x32xf32>
    %c0_26 = arith.constant 0 : index
    %c0_27 = arith.constant 0 : index
    %62 = vector.load %arg5[%c0_26, %c0_27] : memref<1x32xf32, #tpu.memory_space<vmem>>, vector<1x32xf32>
    %63 = vector.broadcast %62 : vector<1x32xf32> to vector<2x32xf32>
    %64 = arith.addf %61, %63 : vector<2x32xf32>
    %65 = vector.extract_strided_slice %9 {offsets = [0, 640], sizes = [2, 32], strides = [1, 1]} : vector<2x1152xf32> to vector<2x32xf32>
    %66 = arith.mulf %52, %65 : vector<2x32xf32>
    %67 = arith.addf %64, %66 : vector<2x32xf32>
    %68 = math.tanh %67 : vector<2x32xf32>
    %69 = arith.subf %3, %68 : vector<2x32xf32>
    %70 = arith.mulf %60, %69 : vector<2x32xf32>
    %71 = arith.addf %68, %70 : vector<2x32xf32>
    %c1_28 = arith.constant 1 : index
    %c0_29 = arith.constant 0 : index
    %c0_30 = arith.constant 0 : index
    %72 = vector.load %arg12[%c1_28, %c0_29, %c0_30] : memref<3x2x32xf32, #tpu.memory_space<vmem>>, vector<1x2x32xf32>
    %73 = vector.shape_cast %72 : vector<1x2x32xf32> to vector<2x32xf32>
    %74 = vector.shape_cast %71 : vector<2x32xf32> to vector<1x2x32xf32>
    tpu.vector_store %arg12[%c1_28, %c0_29, %c0_30], %74 {strides = array<i32>} : memref<3x2x32xf32, #tpu.memory_space<vmem>>, vector<1x2x32xf32>,
    %c0_31 = arith.constant 0 : index
    %c0_32 = arith.constant 0 : index
    %75 = vector.load %arg6[%c0_31, %c0_32] : memref<32x384xf32, #tpu.memory_space<vmem>>, vector<32x384xf32>
    %cst_33 = arith.constant dense<0.000000e+00> : vector<2x384xf32>
    %76 = tpu.matmul %71, %75, %cst_33 {dimension_numbers = #tpu.dot_dimension_numbers<[1], [0], [0], [1], [0, 0, 1, 1], [], []>} : vector<2x32xf32>, vector<32x384xf32>, vector<2x384xf32> -> vector<2x384xf32>
    %77 = vector.extract_strided_slice %76 {offsets = [0, 0], sizes = [2, 32], strides = [1, 1]} : vector<2x384xf32> to vector<2x32xf32>
    %78 = vector.extract_strided_slice %9 {offsets = [0, 768], sizes = [2, 32], strides = [1, 1]} : vector<2x1152xf32> to vector<2x32xf32>
    %79 = arith.addf %77, %78 : vector<2x32xf32>
    %80 = arith.negf %79 : vector<2x32xf32>
    %81 = math.exp %80 : vector<2x32xf32>
    %cst_34 = arith.constant 1.000000e+00 : f32
    %82 = vector.broadcast %cst_34 : f32 to vector<2x32xf32>
    %83 = arith.addf %82, %81 : vector<2x32xf32>
    %84 = arith.divf %82, %83 : vector<2x32xf32>
    %85 = vector.extract_strided_slice %76 {offsets = [0, 128], sizes = [2, 32], strides = [1, 1]} : vector<2x384xf32> to vector<2x32xf32>
    %86 = vector.extract_strided_slice %9 {offsets = [0, 896], sizes = [2, 32], strides = [1, 1]} : vector<2x1152xf32> to vector<2x32xf32>
    %87 = arith.addf %85, %86 : vector<2x32xf32>
    %88 = arith.negf %87 : vector<2x32xf32>
    %89 = math.exp %88 : vector<2x32xf32>
    %cst_35 = arith.constant 1.000000e+00 : f32
    %90 = vector.broadcast %cst_35 : f32 to vector<2x32xf32>
    %91 = arith.addf %90, %89 : vector<2x32xf32>
    %92 = arith.divf %90, %91 : vector<2x32xf32>
    %93 = vector.extract_strided_slice %76 {offsets = [0, 256], sizes = [2, 32], strides = [1, 1]} : vector<2x384xf32> to vector<2x32xf32>
    %c0_36 = arith.constant 0 : index
    %c0_37 = arith.constant 0 : index
    %94 = vector.load %arg7[%c0_36, %c0_37] : memref<1x32xf32, #tpu.memory_space<vmem>>, vector<1x32xf32>
    %95 = vector.broadcast %94 : vector<1x32xf32> to vector<2x32xf32>
    %96 = arith.addf %93, %95 : vector<2x32xf32>
    %97 = vector.extract_strided_slice %9 {offsets = [0, 1024], sizes = [2, 32], strides = [1, 1]} : vector<2x1152xf32> to vector<2x32xf32>
    %98 = arith.mulf %84, %97 : vector<2x32xf32>
    %99 = arith.addf %96, %98 : vector<2x32xf32>
    %100 = math.tanh %99 : vector<2x32xf32>
    %101 = arith.subf %5, %100 : vector<2x32xf32>
    %102 = arith.mulf %92, %101 : vector<2x32xf32>
    %103 = arith.addf %100, %102 : vector<2x32xf32>
    %c2_38 = arith.constant 2 : index
    %c0_39 = arith.constant 0 : index
    %c0_40 = arith.constant 0 : index
    %104 = vector.load %arg12[%c2_38, %c0_39, %c0_40] : memref<3x2x32xf32, #tpu.memory_space<vmem>>, vector<1x2x32xf32>
    %105 = vector.shape_cast %104 : vector<1x2x32xf32> to vector<2x32xf32>
    %106 = vector.shape_cast %103 : vector<2x32xf32> to vector<1x2x32xf32>
    tpu.vector_store %arg12[%c2_38, %c0_39, %c0_40], %106 {strides = array<i32>} : memref<3x2x32xf32, #tpu.memory_space<vmem>>, vector<1x2x32xf32>,
    %c0_41 = arith.constant 0 : index
    %c0_42 = arith.constant 0 : index
    %107 = vector.load %arg9[%c0_41, %c0_42] : memref<1x32xf32, #tpu.memory_space<vmem>>, vector<1x32xf32>
    %108 = vector.broadcast %107 : vector<1x32xf32> to vector<2x32xf32>
    %109 = arith.mulf %103, %108 : vector<2x32xf32>
    %cst_43 = arith.constant dense<0.000000e+00> : vector<2xf32>
    %110 = vector.multi_reduction <add>, %109, %cst_43 [1] : vector<2x32xf32> to vector<2xf32>
    %111 = vector.shape_cast %110 : vector<2xf32> to vector<2x1xf32>
    %c0_44 = arith.constant 0 : index
    %c0_45 = arith.constant 0 : index
    %112 = vector.load %arg10[%c0_44, %c0_45] : memref<1x1xf32, #tpu.memory_space<vmem>>, vector<1x1xf32>
    %113 = vector.broadcast %112 : vector<1x1xf32> to vector<2x1xf32>
    %114 = arith.addf %111, %113 : vector<2x1xf32>
    %c0_46 = arith.constant 0 : index
    %c0_47 = arith.constant 0 : index
    %115 = vector.load %arg11[%c0_46, %c0_47] : memref<2x1xf32, #tpu.memory_space<vmem>>, vector<2x1xf32>
    tpu.vector_store %arg11[%c0_46, %c0_47], %114 {strides = array<i32>} : memref<2x1xf32, #tpu.memory_space<vmem>>, vector<2x1xf32>,
    return
  }
}

</mosaic_0001>

<bundles_post_ra>
// kernel: gru_multilayer_cell_forward.1
= control target key start
LH: loop header
LB: loop body
LE: loop exit
PB: predicated region body
PF: predicated region fallthrough
CT: control target
= control target key end

     0   :  { %s1884_s0 = inlined_call_operand.vmem [shape: f32[2,16], index: 0, kind: input, shape index: {}]   ;;  %s1885_s1 = inlined_call_operand.vmem [shape: f32[3,2,32], index: 1, kind: input, shape index: {}, may-alias: {1,12}]   ;;  %s1886_s2 = inlined_call_operand.hbm [shape: f32[16,384], index: 2, kind: input, shape index: {}]   ;;  %s1887_s3 = inlined_call_operand.vmem [shape: f32[1,32], index: 3, kind: input, shape index: {}]   ;;  %s1888_s4 = inlined_call_operand.hbm [shape: f32[32,384], index: 4, kind: input, shape index: {}]   ;;  %s1889_s5 = inlined_call_operand.vmem [shape: f32[1,32], index: 5, kind: input, shape index: {}]   ;;  %s1890_s6 = inlined_call_operand.hbm [shape: f32[32,384], index: 6, kind: input, shape index: {}]   ;;  %s1891_s7 = inlined_call_operand.vmem [shape: f32[1,32], index: 7, kind: input, shape index: {}]   ;;  %s1892_s8 = inlined_call_operand.hbm [shape: f32[97,1152], index: 8, kind: input, shape index: {}]   ;;  %s1893_s9 = inlined_call_operand.vmem [shape: f32[1,32], index: 9, kind: input, shape index: {}]   ;;  %s1894_s10 = inlined_call_operand.<no memory space> [shape: f32[1,1], index: 10, kind: input, shape index: {}]   ;;  %s1895_s11 = inlined_call_operand.vmem [shape: f32[2,1], index: 11, kind: output, shape index: {0}]   ;;  %s1896_s12 = inlined_call_operand.vmem [shape: f32[3,2,32], index: 12, kind: output, shape index: {1}, may-alias: {1,12}]  }
   0x1   :  { %v18_v0 = vstv %s1894_s10 }
   0x2   :  { %19 = vst [vmem:[#allocation2] sm:$0x1] %v18_v0 }
   0x3   :  { %20 = vsyncpa [#allocation4], 0 }
   0x4   :  { %21 = vsyncpa [#allocation6], 0 }
   0x5   :  { %22 = vsyncpa [#allocation9], 0  ;;  %s1615_s23 = smov [#allocation5]   ;;  %s1616_s25 = smov [#allocation3]  }
   0x6   :  { %s46_s24 = sshll.u32 %s1615_s23, 4  ;;  %s32_s26 = sshll.u32 %s1616_s25, 4  ;;  %s47_s24 = int_to_ptr.vmem [resolvable:$true] %s46_s24  ;;  %s1696_s26 = int_to_ptr.vmem [resolvable:$true] %s32_s26 }
   0x7   :  { %s1521_s29 = scalar_lea.hbm %s1888_s4, 1536 }
   0x8   :  { %p1522_p0 = scmp.ne.s32.totalorder %s1888_s4, %s1521_s29  ;;  %p1525_p1 = scmp.lt.u32.totalorder %s1521_s29, %s1888_s4 }
   0xa   :  { %p1527_p2 = pnand %p1525_p1, %p1522_p0 }
   0xc   :  { %1530 = shalt.err (!%p1527_p2)
}
   0xd   :  { %s1531_s15 = scalar_lea.vmem %s47_s24, 1536  ;;  %p1536_p4 = scmp.lt.s32.totalorder %s47_s24, %s47_s24 }
   0xe   :  { %p1532_p3 = scmp.ne.s32.totalorder %s47_s24, %s1531_s15  ;;  %p1537_p5 = scmp.lt.s32.totalorder %s1531_s15, %s1531_s15 }
  0x10   :  { %p1538_p6 = por %p1537_p5, %p1536_p4 }
  0x12   :  { %p1539_p7 = pnand %p1538_p6, %p1532_p3 }
  0x14   :  { %1542 = shalt.err (!%p1539_p7)
}
  0x15   :  { %s1617_s16 = smov 384   ;;  %s1618_s17 = smov 24  }
  0x16   :  { %52 = dma.hbm_to_vmem [thread:$0]  %s1888_s4, 1536, %s47_s24, [#allocation6], %s1617_s16, %s1617_s16, %s1618_s17  }
  0x17   :  { %s1543_s22 = scalar_lea.hbm %s1886_s2, 768 }
  0x18   :  { %p1544_p8 = scmp.ne.s32.totalorder %s1886_s2, %s1543_s22  ;;  %p1547_p9 = scmp.lt.u32.totalorder %s1543_s22, %s1886_s2 }
  0x1a   :  { %p1549_p10 = pnand %p1547_p9, %p1544_p8 }
  0x1c   :  { %1552 = shalt.err (!%p1549_p10)
}
  0x1d   :  { %s1553_s29 = scalar_lea.vmem %s1696_s26, 768  ;;  %p1558_p12 = scmp.lt.s32.totalorder %s1696_s26, %s1696_s26 }
  0x1e   :  { %p1554_p11 = scmp.ne.s32.totalorder %s1696_s26, %s1553_s29  ;;  %p1559_p13 = scmp.lt.s32.totalorder %s1553_s29, %s1553_s29 }
  0x20   :  { %p1560_p0 = por %p1559_p13, %p1558_p12 }
  0x22   :  { %p1561_p1 = pnand %p1560_p0, %p1554_p11 }
  0x24   :  { %1564 = shalt.err (!%p1561_p1)
}
  0x25   :  { %38 = dma.hbm_to_vmem [thread:$0]  %s1886_s2, 768, %s1696_s26, [#allocation4], %s1617_s16, %s1617_s16, %s1618_s17  }
  0x26   :  { %s1619_s30 = smov [#allocation7]   ;;  %s1620_s10 = smov [#allocation8]  }
  0x27   :  { %s60_s13 = sshll.u32 %s1619_s30, 4  ;;  %s74_s14 = sshll.u32 %s1620_s10, 4  ;;  %s61_s13 = int_to_ptr.vmem [resolvable:$true] %s60_s13  ;;  %s1733_s14 = int_to_ptr.vmem [resolvable:$true] %s74_s14 }
  0x28   :  { %s1565_s19 = scalar_lea.hbm %s1890_s6, 1536 }
  0x29   :  { %p1566_p2 = scmp.ne.s32.totalorder %s1890_s6, %s1565_s19  ;;  %p1569_p3 = scmp.lt.u32.totalorder %s1565_s19, %s1890_s6 }
  0x2b   :  { %p1571_p4 = pnand %p1569_p3, %p1566_p2 }
  0x2d   :  { %1574 = shalt.err (!%p1571_p4)
}
  0x2e   :  { %s1575_s2 = scalar_lea.vmem %s61_s13, 1536  ;;  %p1580_p6 = scmp.lt.s32.totalorder %s61_s13, %s61_s13 }
  0x2f   :  { %p1576_p5 = scmp.ne.s32.totalorder %s61_s13, %s1575_s2  ;;  %p1581_p7 = scmp.lt.s32.totalorder %s1575_s2, %s1575_s2 }
  0x31   :  { %p1582_p8 = por %p1581_p7, %p1580_p6 }
  0x33   :  { %p1583_p9 = pnand %p1582_p8, %p1576_p5 }
  0x35   :  { %1586 = shalt.err (!%p1583_p9)
}
  0x36   :  { %66 = dma.hbm_to_vmem [thread:$0]  %s1890_s6, 1536, %s61_s13, [#allocation6], %s1617_s16, %s1617_s16, %s1618_s17  }
  0x37   :  { %s1587_s29 = scalar_lea.hbm %s1892_s8, 14976 }
  0x38   :  { %p1588_p10 = scmp.ne.s32.totalorder %s1892_s8, %s1587_s29  ;;  %p1591_p11 = scmp.lt.u32.totalorder %s1587_s29, %s1892_s8 }
  0x3a   :  { %p1593_p12 = pnand %p1591_p11, %p1588_p10 }
  0x3c   :  { %1596 = shalt.err (!%p1593_p12)
}
  0x3d   :  { %s1597_s15 = scalar_lea.vmem %s1733_s14, 14976  ;;  %p1602_p0 = scmp.lt.s32.totalorder %s1733_s14, %s1733_s14 }
  0x3e   :  { %p1598_p13 = scmp.ne.s32.totalorder %s1733_s14, %s1597_s15  ;;  %p1603_p1 = scmp.lt.s32.totalorder %s1597_s15, %s1597_s15 }
  0x40   :  { %p1604_p2 = por %p1603_p1, %p1602_p0 }
  0x42   :  { %p1605_p3 = pnand %p1604_p2, %p1598_p13 }
  0x44   :  { %1608 = shalt.err (!%p1605_p3)
}
  0x45   :  { %s1621_s6 = smov 1152   ;;  %s1622_s16 = smov 72  }
  0x46   :  { %80 = dma.hbm_to_vmem [thread:$0]  %s1892_s8, 14976, %s1733_s14, [#allocation9], %s1621_s6, %s1621_s6, %s1622_s16  }
  0x47   :  { %1609 = dma.done.wait [#allocation4], 768  }
  0x48   :  { %1610 = vsyncadd [#allocation4], 4294966528 }
  0x49   :  { %1611 = dma.done.wait [#allocation6], 3072  }
  0x4a   :  { %1612 = vsyncadd [#allocation6], 4294964224 }
  0x4b   :  { %1613 = dma.done.wait [#allocation9], 14976  }
  0x4c   :  { %1614 = vsyncadd [#allocation9], 4294952320  ;;  %v1623_v1 = vmov 0.0   ;;  %v1772_v2 = vld [vmem:[%s1885_s1 + $0x2] sm:$0x3]  ;;  %v117_v4 = vld [vmem:[#allocation8 + $0x8] sm:$0xff] }
  0x4d   :  { %329 = vmatprep.mubr.f32.mxu0 %v1623_v1  ;;  %400 = vmatprep.mubr.f32.mxu1 %v1623_v1  ;;  %v1777_v3 = vld [vmem:[%s1885_s1 + $0x4] sm:$0x3]  ;;  %s1624_s8 = smov 32   ;;  %v119_v6 = vld [vmem:[#allocation8 + $0x18] sm:$0xff]  ;;  %v128_v7 = vld [vmem:[#allocation8 + $0x60] sm:$0xff]  ;;  %s1625_s14 = smov 64  }
  0x4e   :  { %103 = vrot.lane.b32.xlu0 %v1772_v2, %s1624_s8  ;;  %v126_v5 = vld [vmem:[#allocation8 + $0x50] sm:$0xff]  ;;  %v1349_v9 = vpack.c.bf16 %v128_v7, %v119_v6  ;;  %v116_v10 = vld [vmem:[#allocation8] sm:$0xff]  ;;  %v125_v11 = vld [vmem:[#allocation8 + $0x48] sm:$0xff]  ;;  %vm237_vm0 = vcmask 1040384   ;;  %vm110_vm1 = vcmask 261120   ;;  %vm112_vm2 = vcmask 523264  }
  0x4f   :  { %v1325_v8 = vpack.c.bf16 %v126_v5, %v117_v4  ;;  %v118_v12 = vld [vmem:[#allocation8 + $0x10] sm:$0xff]  ;;  %v1327_v13 = vpack.c.bf16 %v125_v11, %v116_v10  ;;  %v127_v14 = vld [vmem:[#allocation8 + $0x58] sm:$0xff]  ;;  %v144_v16 = vld [vmem:[#allocation8 + $0xe0] sm:$0xff]  ;;  %vm114_vm3 = vcmask 785408   ;;  %vm233_vm4 = vcmask 793600  }
  0x50   :  { %v135_v15 = vld [vmem:[#allocation8 + $0x98] sm:$0xff]  ;;  %1350 = vmatprep.subr.bf16.mxu1 %v1349_v9  ;;  %v1351_v17 = vpack.c.bf16 %v127_v14, %v118_v12  ;;  %v137_v19 = vld [vmem:[#allocation8 + $0xa8] sm:$0xff]  ;;  %v146_v20 = vld [vmem:[#allocation8 + $0xf0] sm:$0xff]  ;;  %vm1627_vm5 = vmmov 0   ;;  %vm626_vm6 = vcmask 130048   ;;  %vm799_vm7 = vcmask 254976  }
  0x51   :  { %1326 = vmatprep.subr.bf16.mxu0 %v1325_v8  ;;  %v1329_v18 = vpack.c.bf16 %v144_v16, %v135_v15  ;;  %v134_v21 = vld [vmem:[#allocation8 + $0x90] sm:$0xff]  ;;  %v1353_v22 = vpack.c.bf16 %v146_v20, %v137_v19  ;;  %v143_v23 = vld [vmem:[#allocation8 + $0xd8] sm:$0xff]  ;;  %v136_v24 = vld [vmem:[#allocation8 + $0xa0] sm:$0xff]  ;;  %vm1192_vm8 = vcmask 1024  }
  0x52   :  { %107 = vrot.lane.b32.xlu0 %v1777_v3, %s1625_s14  ;;  %1328 = vmatpush1.bf16.msra.mxu0 %v1327_v13  ;;  %v145_v25 = vld [vmem:[#allocation8 + $0xe8] sm:$0xff]  ;;  %v1331_v26 = vpack.c.bf16 %v143_v23, %v134_v21  ;;  %v162_v29 = vld [vmem:[#allocation8 + $0x170] sm:$0xff]  ;;  %v155_v30 = vld [vmem:[#allocation8 + $0x138] sm:$0xff] }
  0x53   :  { %1352 = vmatpush1.bf16.msra.mxu1 %v1351_v17  ;;  %1330 = vmatprep.subr.bf16.mxu0 %v1329_v18  ;;  %v1355_v27 = vpack.c.bf16 %v145_v25, %v136_v24  ;;  %v153_v28 = vld [vmem:[#allocation8 + $0x128] sm:$0xff]  ;;  %v164_v32 = vld [vmem:[#allocation8 + $0x180] sm:$0xff]  ;;  %v154_v36 = vld [vmem:[#allocation8 + $0x130] sm:$0xff] }
  0x54   :  { %1354 = vmatprep.subr.bf16.mxu1 %v1353_v22  ;;  %v1333_v31 = vpack.c.bf16 %v162_v29, %v153_v28  ;;  %v152_v33 = vld [vmem:[#allocation8 + $0x120] sm:$0xff]  ;;  %v161_v34 = vld [vmem:[#allocation8 + $0x168] sm:$0xff]  ;;  %v1357_v35 = vpack.c.bf16 %v164_v32, %v155_v30  ;;  %v163_v37 = vld [vmem:[#allocation8 + $0x178] sm:$0xff] }
  0x55   :  { %v171_v38 = vld [vmem:[#allocation8 + $0x1b8] sm:$0xff]  ;;  %v1335_v39 = vpack.c.bf16 %v161_v34, %v152_v33  ;;  %v180_v40 = vld [vmem:[#allocation8 + $0x200] sm:$0xff]  ;;  %v173_v41 = vld [vmem:[#allocation8 + $0x1c8] sm:$0xff]  ;;  %v1359_v43 = vpack.c.bf16 %v163_v37, %v154_v36 }
  0x56   :  { %1332 = vmatpush1.bf16.msra.mxu0 %v1331_v26  ;;  %v182_v42 = vld [vmem:[#allocation8 + $0x210] sm:$0xff]  ;;  %v1337_v44 = vpack.c.bf16 %v180_v40, %v171_v38  ;;  %v179_v46 = vld [vmem:[#allocation8 + $0x1f8] sm:$0xff]  ;;  %v172_v47 = vld [vmem:[#allocation8 + $0x1c0] sm:$0xff] }
  0x57   :  { %1356 = vmatpush1.bf16.msra.mxu1 %v1355_v27  ;;  %1334 = vmatprep.subr.bf16.mxu0 %v1333_v31  ;;  %v170_v45 = vld [vmem:[#allocation8 + $0x1b0] sm:$0xff]  ;;  %v1361_v48 = vpack.c.bf16 %v182_v42, %v173_v41  ;;  %v181_v49 = vld [vmem:[#allocation8 + $0x208] sm:$0xff]  ;;  %v191_v52 = vld [vmem:[#allocation8 + $0x258] sm:$0xff] }
  0x58   :  { %1358 = vmatprep.subr.bf16.mxu1 %v1357_v35  ;;  %v189_v50 = vld [vmem:[#allocation8 + $0x248] sm:$0xff]  ;;  %v198_v51 = vld [vmem:[#allocation8 + $0x290] sm:$0xff]  ;;  %v200_v53 = vld [vmem:[#allocation8 + $0x2a0] sm:$0xff]  ;;  %v1339_v54 = vpack.c.bf16 %v179_v46, %v170_v45  ;;  %v1363_v55 = vpack.c.bf16 %v181_v49, %v172_v47 }
  0x59   :  { %v1341_v56 = vpack.c.bf16 %v198_v51, %v189_v50  ;;  %v188_v57 = vld [vmem:[#allocation8 + $0x240] sm:$0xff]  ;;  %v197_v58 = vld [vmem:[#allocation8 + $0x288] sm:$0xff]  ;;  %v190_v59 = vld [vmem:[#allocation8 + $0x250] sm:$0xff]  ;;  %v1365_v60 = vpack.c.bf16 %v200_v53, %v191_v52 }
  0x5a   :  { %1336 = vmatpush1.bf16.msra.mxu0 %v1335_v39  ;;  %v199_v61 = vld [vmem:[#allocation8 + $0x298] sm:$0xff]  ;;  %v216_v63 = vld [vmem:[#allocation8 + $0x320] sm:$0xff]  ;;  %v209_v0 = vld [vmem:[#allocation8 + $0x2e8] sm:$0xff]  ;;  %v1343_v5 = vpack.c.bf16 %v197_v58, %v188_v57 }
  0x5b   :  { %1360 = vmatpush1.bf16.msra.mxu1 %v1359_v43  ;;  %1338 = vmatprep.subr.bf16.mxu0 %v1337_v44  ;;  %v207_v62 = vld [vmem:[#allocation8 + $0x2d8] sm:$0xff]  ;;  %v218_v4 = vld [vmem:[#allocation8 + $0x330] sm:$0xff]  ;;  %v1367_v6 = vpack.c.bf16 %v199_v61, %v190_v59  ;;  %v208_v11 = vld [vmem:[#allocation8 + $0x2e0] sm:$0xff] }
  0x5c   :  { %1362 = vmatprep.subr.bf16.mxu1 %v1361_v48  ;;  %v1345_v7 = vpack.c.bf16 %v216_v63, %v207_v62  ;;  %v206_v8 = vld [vmem:[#allocation8 + $0x2d0] sm:$0xff]  ;;  %v215_v9 = vld [vmem:[#allocation8 + $0x318] sm:$0xff]  ;;  %v1369_v10 = vpack.c.bf16 %v218_v4, %v209_v0  ;;  %v217_v12 = vld [vmem:[#allocation8 + $0x328] sm:$0xff] }
  0x5d   :  { %v1347_v13 = vpack.c.bf16 %v215_v9, %v206_v8  ;;  %v1371_v14 = vpack.c.bf16 %v217_v12, %v208_v11  ;;  %v225_v15 = vld [vmem:[#allocation8 + $0x368] sm:$0x1]  ;;  %v130_v17 = vld [vmem:[#allocation8 + $0x70] sm:$0xff]  ;;  %v227_v18 = vld [vmem:[#allocation8 + $0x378] sm:$0x1] }
  0x5e   :  { %1340 = vmatpush1.bf16.msra.mxu0 %v1339_v54  ;;  %v121_v16 = vld [vmem:[#allocation8 + $0x28] sm:$0xff]  ;;  %v123_v19 = vld [vmem:[#allocation8 + $0x38] sm:$0xff]  ;;  %v132_v20 = vld [vmem:[#allocation8 + $0x80] sm:$0xff] }
  0x5f   :  { %1364 = vmatpush1.bf16.msra.mxu1 %v1363_v55  ;;  %1342 = vmatprep.subr.bf16.mxu0 %v1341_v56  ;;  %v224_v21 = vld [vmem:[#allocation8 + $0x360] sm:$0x1]  ;;  %v1373_v22 = vpack.c.bf16 %v130_v17, %v121_v16  ;;  %v226_v23 = vld [vmem:[#allocation8 + $0x370] sm:$0x1]  ;;  %v1397_v24 = vpack.c.bf16 %v132_v20, %v123_v19  ;;  %v129_v28 = vld [vmem:[#allocation8 + $0x68] sm:$0xff] }
  0x60   :  { %1366 = vmatprep.subr.bf16.mxu1 %v1365_v60  ;;  %v1788_v26 = vld [vmem:[%s1885_s1] sm:$0x3]  ;;  %v120_v27 = vld [vmem:[#allocation8 + $0x20] sm:$0xff]  ;;  %v131_v30 = vld [vmem:[#allocation8 + $0x78] sm:$0xff] }
  0x61   :  { %v122_v29 = vld [vmem:[#allocation8 + $0x30] sm:$0xff]  ;;  %v139_v31 = vld [vmem:[#allocation8 + $0xb8] sm:$0xff]  ;;  %v148_v32 = vld [vmem:[#allocation8 + $0x100] sm:$0xff]  ;;  %v1375_v37 = vpack.c.bf16 %v129_v28, %v120_v27 }
  0x62   :  { %1344 = vmatpush1.bf16.msra.mxu0 %v1343_v5  ;;  %v141_v33 = vld [vmem:[#allocation8 + $0xc8] sm:$0xff]  ;;  %v150_v34 = vld [vmem:[#allocation8 + $0x110] sm:$0xff]  ;;  %v1399_v38 = vpack.c.bf16 %v131_v30, %v122_v29  ;;  %v147_v40 = vld [vmem:[#allocation8 + $0xf8] sm:$0xff]  ;;  %v1377_v42 = vpack.c.bf16 %v148_v32, %v139_v31 }
  0x63   :  { %1368 = vmatpush1.bf16.msra.mxu1 %v1367_v6  ;;  %1346 = vmatprep.subr.bf16.mxu0 %v1345_v7  ;;  %v138_v39 = vld [vmem:[#allocation8 + $0xb0] sm:$0xff]  ;;  %v1401_v43 = vpack.c.bf16 %v150_v34, %v141_v33  ;;  %v140_v44 = vld [vmem:[#allocation8 + $0xc0] sm:$0xff]  ;;  %v149_v45 = vld [vmem:[#allocation8 + $0x108] sm:$0xff] }
  0x64   :  { %1370 = vmatprep.subr.bf16.mxu1 %v1369_v10  ;;  %v157_v46 = vld [vmem:[#allocation8 + $0x148] sm:$0xff]  ;;  %v166_v48 = vld [vmem:[#allocation8 + $0x190] sm:$0xff]  ;;  %v159_v49 = vld [vmem:[#allocation8 + $0x158] sm:$0xff]  ;;  %v1379_v51 = vpack.c.bf16 %v147_v40, %v138_v39  ;;  %v1403_v52 = vpack.c.bf16 %v149_v45, %v140_v44 }
  0x65   :  { %v168_v50 = vld [vmem:[#allocation8 + $0x1a0] sm:$0xff]  ;;  %v165_v54 = vld [vmem:[#allocation8 + $0x188] sm:$0xff]  ;;  %v1381_v55 = vpack.c.bf16 %v166_v48, %v157_v46  ;;  %v158_v57 = vld [vmem:[#allocation8 + $0x150] sm:$0xff]  ;;  %v1626_v46 = vmov 0.0|0.0  }
  0x66   :  { %1348 = vmatpush1.bf16.msra.mxu0 %v1347_v13  ;;  %v156_v53 = vld [vmem:[#allocation8 + $0x140] sm:$0xff]  ;;  %v1405_v56 = vpack.c.bf16 %v168_v50, %v159_v49  ;;  %v167_v58 = vld [vmem:[#allocation8 + $0x198] sm:$0xff]  ;;  %v177_v61 = vld [vmem:[#allocation8 + $0x1e8] sm:$0xff] }
  0x67   :  { %1372 = vmatpush1.bf16.msra.mxu1 %v1371_v14  ;;  %1207 = vmatprep.subr.msk.mxu0 %vm237_vm0, %v225_v15  ;;  %v175_v59 = vld [vmem:[#allocation8 + $0x1d8] sm:$0xff]  ;;  %v184_v60 = vld [vmem:[#allocation8 + $0x220] sm:$0xff]  ;;  %v186_v62 = vld [vmem:[#allocation8 + $0x230] sm:$0xff]  ;;  %v1383_v63 = vpack.c.bf16 %v165_v54, %v156_v53  ;;  %v1407_v0 = vpack.c.bf16 %v167_v58, %v158_v57 }
  0x68   :  { %1210 = vmatprep.subr.msk.mxu1 %vm237_vm0, %v227_v18  ;;  %v174_v4 = vld [vmem:[#allocation8 + $0x1d0] sm:$0xff]  ;;  %v183_v5 = vld [vmem:[#allocation8 + $0x218] sm:$0xff]  ;;  %v1385_v6 = vpack.c.bf16 %v184_v60, %v175_v59  ;;  %v1409_v7 = vpack.c.bf16 %v186_v62, %v177_v61  ;;  %v176_v8 = vld [vmem:[#allocation8 + $0x1e0] sm:$0xff] }
  0x69   :  { %v185_v9 = vld [vmem:[#allocation8 + $0x228] sm:$0xff]  ;;  %v202_v11 = vld [vmem:[#allocation8 + $0x2b0] sm:$0xff]  ;;  %v195_v12 = vld [vmem:[#allocation8 + $0x278] sm:$0xff]  ;;  %v1387_v14 = vpack.c.bf16 %v183_v5, %v174_v4 }
  0x6a   :  { %1208 = vmatpush1.msk.msra.mxu0 %vm237_vm0, %v224_v21  ;;  %v193_v10 = vld [vmem:[#allocation8 + $0x268] sm:$0xff]  ;;  %v204_v13 = vld [vmem:[#allocation8 + $0x2c0] sm:$0xff]  ;;  %v1411_v15 = vpack.c.bf16 %v185_v9, %v176_v8  ;;  %v194_v20 = vld [vmem:[#allocation8 + $0x270] sm:$0xff] }
  0x6b   :  { %1211 = vmatpush1.msk.msra.mxu1 %vm237_vm0, %v226_v23  ;;  %1374 = vmatprep.subr.bf16.mxu0 %v1373_v22  ;;  %v192_v16 = vld [vmem:[#allocation8 + $0x260] sm:$0xff]  ;;  %v201_v17 = vld [vmem:[#allocation8 + $0x2a8] sm:$0xff]  ;;  %v1389_v18 = vpack.c.bf16 %v202_v11, %v193_v10  ;;  %v1413_v19 = vpack.c.bf16 %v204_v13, %v195_v12  ;;  %v203_v21 = vld [vmem:[#allocation8 + $0x2b8] sm:$0xff] }
  0x6c   :  { %1398 = vmatprep.subr.bf16.mxu1 %v1397_v24  ;;  %v211_v22 = vld [vmem:[#allocation8 + $0x2f8] sm:$0xff]  ;;  %v220_v23 = vld [vmem:[#allocation8 + $0x340] sm:$0xff]  ;;  %v213_v24 = vld [vmem:[#allocation8 + $0x308] sm:$0xff]  ;;  %v1391_v27 = vpack.c.bf16 %v201_v17, %v192_v16  ;;  %v1415_v28 = vpack.c.bf16 %v203_v21, %v194_v20 }
  0x6d   :  { %v210_v29 = vld [vmem:[#allocation8 + $0x2f0] sm:$0xff]  ;;  %v1393_v30 = vpack.c.bf16 %v220_v23, %v211_v22  ;;  %v219_v32 = vld [vmem:[#allocation8 + $0x338] sm:$0xff]  ;;  %v212_v33 = vld [vmem:[#allocation8 + $0x300] sm:$0xff] }
  0x6e   :  { %v221_v34 = vld [vmem:[#allocation8 + $0x348] sm:$0xff]  ;;  %v124_v39 = vld [vmem:[#allocation8 + $0x40] sm:$0xff]  ;;  %v142_v44 = vld [vmem:[#allocation8 + $0xd0] sm:$0xff] }
  0x6f   :  { %v133_v40 = vld [vmem:[#allocation8 + $0x88] sm:$0xff]  ;;  %v151_v45 = vld [vmem:[#allocation8 + $0x118] sm:$0xff]  ;;  %v160_v49 = vld [vmem:[#allocation8 + $0x160] sm:$0xff] }
  0x70   :  { %v1425_v48 = vpack.c.bf16 %v151_v45, %v142_v44  ;;  %v169_v50 = vld [vmem:[#allocation8 + $0x1a8] sm:$0xff]  ;;  %v187_v53 = vld [vmem:[#allocation8 + $0x238] sm:$0xff]  ;;  %v214_v58 = vld [vmem:[#allocation8 + $0x310] sm:$0xff] }
  0x71   :  { %v223_v59 = vld [vmem:[#allocation8 + $0x358] sm:$0xff]  ;;  %v624_v62 = vld [vmem:[#allocation3 + $0x20] sm:$0xff]  ;;  %v232_v4 = vld [vmem:[#allocation8 + $0x3a0] sm:$0x1] }
  0x72   :  { %v1437_v60 = vpack.c.bf16 %v223_v59, %v214_v58  ;;  %v621_v61 = vld [vmem:[#allocation3 + $0x8] sm:$0xff]  ;;  %v619_v9 = vld [vmem:[%s1884_s0] sm:$0x3]  ;;  %v801_v13 = vld [vmem:[#allocation5] sm:$0xff] }
  0x73   :  { %v1439_v5 = vpack.c.bf16 %v624_v62, %v621_v61  ;;  %v625_v8 = vld [vmem:[#allocation3 + $0x28] sm:$0xff]  ;;  %v802_v11 = vld [vmem:[#allocation5 + $0x8] sm:$0xff]  ;;  %v811_v17 = vld [vmem:[#allocation5 + $0x50] sm:$0xff] }
  0x74   :  { %v808_v16 = vld [vmem:[#allocation5 + $0x38] sm:$0xff]  ;;  %v810_v20 = vld [vmem:[#allocation5 + $0x48] sm:$0xff]  ;;  %v987_v59 = vld [vmem:[#allocation7] sm:$0xff] }
  0x75   :  { %v994_v62 = vld [vmem:[#allocation7 + $0x38] sm:$0xff] }
  0xc0   :  { %v104_v25 = vpop.permute.xlu0 %103 }
  0xc1   :  { %v111_v35 = vsel %vm110_vm1, %v1788_v26, %v104_v25  ;;  %v222_v25 = vld [vmem:[#allocation8 + $0x350] sm:$0xff] }
  0xc2   :  { %v1417_v31 = vpack.c.bf16 %v222_v25, %v213_v24 }
  0xc4   :  { %v108_v36 = vpop.permute.xlu0 %107 }
  0xc5   :  { %v113_v41 = vsel %vm112_vm2, %v111_v35, %v108_v36  ;;  %v1395_v35 = vpack.c.bf16 %v219_v32, %v210_v29  ;;  %v1419_v36 = vpack.c.bf16 %v221_v34, %v212_v33 }
  0xc6   :  { %v1792_v47 = vsel %vm114_vm3, %v113_v41, 1.0  ;;  %v228_v41 = vld [vmem:[#allocation8 + $0x380] sm:$0x1] }
  0xc7   :  { %1209 = vmatmul.mubr.msk.f32.vlgmr.msra.gmra.mrb[0].mxu0 %vm233_vm4, %v1792_v47  ;;  %1212 = vmatmul.mubr.msk.f32.vlgmr.msra.gmra.mrb[0].mxu1 %vm233_vm4, %v1792_v47 }
  0xc8   :  { %1376 = vmatpush1.bf16.msra.mxu0 %v1375_v37  ;;  %1400 = vmatpush1.bf16.msra.mxu1 %v1399_v38  ;;  %v229_v37 = vld [vmem:[#allocation8 + $0x388] sm:$0x1]  ;;  %v231_v38 = vld [vmem:[#allocation8 + $0x398] sm:$0x1] }
  0xc9   :  { %1378 = vmatprep.subr.bf16.mxu0 %v1377_v42  ;;  %1402 = vmatprep.subr.bf16.mxu1 %v1401_v43  ;;  %v230_v42 = vld [vmem:[#allocation8 + $0x390] sm:$0x1]  ;;  %v1422_v43 = vpack.c.bf16 %v133_v40, %v124_v39 }
  0xca   :  { %471 = vmatprep.mubr.f32.mxu0 %v1623_v1  ;;  %542 = vmatprep.mubr.f32.mxu1 %v1623_v1 }
  0xcc   :  { %1380 = vmatpush1.bf16.msra.mxu0 %v1379_v51  ;;  %1404 = vmatpush1.bf16.msra.mxu1 %v1403_v52  ;;  %v1428_v51 = vpack.c.bf16 %v169_v50, %v160_v49  ;;  %v178_v52 = vld [vmem:[#allocation8 + $0x1f0] sm:$0xff]  ;;  %v806_v49 = vld [vmem:[#allocation5 + $0x28] sm:$0xff] }
  0xcd   :  { %1382 = vmatprep.subr.bf16.mxu0 %v1381_v55  ;;  %1406 = vmatprep.subr.bf16.mxu1 %v1405_v56  ;;  %v1431_v54 = vpack.c.bf16 %v187_v53, %v178_v52  ;;  %v196_v55 = vld [vmem:[#allocation8 + $0x280] sm:$0xff]  ;;  %v205_v56 = vld [vmem:[#allocation8 + $0x2c8] sm:$0xff] }
  0xce   :  { %v1434_v57 = vpack.c.bf16 %v205_v56, %v196_v55  ;;  %v812_v55 = vld [vmem:[#allocation5 + $0x58] sm:$0xff] }
  0xd0   :  { %1384 = vmatpush1.bf16.msra.mxu0 %v1383_v63  ;;  %1408 = vmatpush1.bf16.msra.mxu1 %v1407_v0  ;;  %v620_v63 = vld [vmem:[#allocation3] sm:$0xff]  ;;  %v623_v0 = vld [vmem:[#allocation3 + $0x18] sm:$0xff] }
  0xd1   :  { %1386 = vmatprep.subr.bf16.mxu0 %v1385_v6  ;;  %1410 = vmatprep.subr.bf16.mxu1 %v1409_v7  ;;  %v1441_v6 = vpack.c.bf16 %v623_v0, %v620_v63  ;;  %v622_v7 = vld [vmem:[#allocation3 + $0x10] sm:$0xff]  ;;  %v997_v63 = vld [vmem:[#allocation7 + $0x50] sm:$0xff] }
  0xd2   :  { %v1444_v10 = vpack.c.bf16 %v625_v8, %v622_v7  ;;  %v1464_v0 = vpack.c.bf16 %v997_v63, %v994_v62 }
  0xd4   :  { %1388 = vmatpush1.bf16.msra.mxu0 %v1387_v14  ;;  %1412 = vmatpush1.bf16.msra.mxu1 %v1411_v15  ;;  %v804_v14 = vld [vmem:[#allocation5 + $0x18] sm:$0xff] }
  0xd5   :  { %1390 = vmatprep.subr.bf16.mxu0 %v1389_v18  ;;  %1414 = vmatprep.subr.bf16.mxu1 %v1413_v19  ;;  %v1448_v15 = vpack.c.bf16 %v804_v14, %v801_v13  ;;  %v1450_v18 = vpack.c.bf16 %v811_v17, %v808_v16  ;;  %v807_v19 = vld [vmem:[#allocation5 + $0x30] sm:$0xff]  ;;  %v1230_v16 = vld [vmem:[%s1889_s5] ss:$0 sm:$0xff] }
  0xd6   :  { %v1452_v21 = vpack.c.bf16 %v810_v20, %v807_v19 }
  0xd8   :  { %1392 = vmatpush1.bf16.msra.mxu0 %v1391_v27  ;;  %1416 = vmatpush1.bf16.msra.mxu1 %v1415_v28 }
  0xd9   :  { %1394 = vmatprep.subr.bf16.mxu0 %v1393_v30  ;;  %1418 = vmatprep.subr.bf16.mxu1 %v1417_v31 }
  0xdc   :  { %1396 = vmatpush1.bf16.msra.mxu0 %v1395_v35  ;;  %1420 = vmatpush1.bf16.msra.mxu1 %v1419_v36 }
  0xdd   :  { %1213 = vmatprep.subr.msk.mxu0 %vm237_vm0, %v229_v37  ;;  %1216 = vmatprep.subr.msk.mxu1 %vm237_vm0, %v231_v38  ;;  %v1225_v37 = vld [vmem:[%s1887_s3] ss:$0 sm:$0xff] }
  0xe0   :  { %1214 = vmatpush1.msk.msra.mxu0 %vm237_vm0, %v228_v41  ;;  %1217 = vmatpush1.msk.msra.mxu1 %vm237_vm0, %v230_v42 }
  0xe1   :  { %1215 = vmatmul.mubr.msk.f32.vlgmr.msra.gmra.mrb[2].mxu0 %vm233_vm4, %v1792_v47  ;;  %1218 = vmatmul.mubr.msk.f32.vlgmr.msra.gmra.mrb[2].mxu1 %vm233_vm4, %v1792_v47 }
  0xe2   :  { %1421 = vmatprep.subr.bf16.mxu0 %v1626_v46  ;;  %1293 = vmatprep.mubr.msk.f32.mxu0 %vm1627_vm5, %v1623_v1 }
  0xe3   :  { %1423 = vmatpush3.bf16.msra.mxu0 %v1422_v43  ;;  %880 = vmatprep.mubr.f32.mxu1 %v1623_v1 }
  0xe4   :  { %1424 = vmatprep.subr.bf16.mxu0 %v1626_v46 }
  0xe7   :  { %1426 = vmatpush3.bf16.msra.mxu0 %v1425_v48  ;;  %v803_v48 = vld [vmem:[#allocation5 + $0x10] sm:$0xff] }
  0xe8   :  { %1427 = vmatprep.subr.bf16.mxu0 %v1626_v46  ;;  %v1455_v52 = vpack.c.bf16 %v806_v49, %v803_v48 }
  0xeb   :  { %1429 = vmatpush3.bf16.msra.mxu0 %v1428_v51 }
  0xec   :  { %1430 = vmatprep.subr.bf16.mxu0 %v1626_v46 }
  0xef   :  { %1432 = vmatpush3.bf16.msra.mxu0 %v1431_v54  ;;  %v809_v54 = vld [vmem:[#allocation5 + $0x40] sm:$0xff] }
  0xf0   :  { %1433 = vmatprep.subr.bf16.mxu0 %v1626_v46  ;;  %v1458_v56 = vpack.c.bf16 %v812_v55, %v809_v54  ;;  %v1238_v54 = vld [vmem:[%s1893_s9] ss:$0 sm:$0xff] }
  0xf3   :  { %1435 = vmatpush3.bf16.msra.mxu0 %v1434_v57  ;;  %v991_v57 = vld [vmem:[#allocation7 + $0x20] sm:$0xff] }
  0xf4   :  { %1436 = vmatprep.subr.bf16.mxu0 %v1626_v46 }
  0xf7   :  { %1438 = vmatpush3.bf16.msra.mxu0 %v1437_v60  ;;  %v990_v60 = vld [vmem:[#allocation7 + $0x18] sm:$0xff] }
  0xf8   :  { %1291 = vmatprep.subr.mxu0 %v1623_v1  ;;  %v1462_v61 = vpack.c.bf16 %v990_v60, %v987_v59 }
  0xfb   :  { %1292 = vmatpush3.msk.msra.mxu0 %vm237_vm0, %v232_v4  ;;  %v993_v4 = vld [vmem:[#allocation7 + $0x30] sm:$0xff] }
  0xfc   :  { %1294 = vmatmul.mubr.msk.f32.vlgmr.msra.gmra.mrb[4].mxu0 %vm233_vm4, %v1792_v47  ;;  %1440 = vmatprep.subr.bf16.mxu0 %v1439_v5  ;;  %v805_v47 = vld [vmem:[#allocation5 + $0x20] sm:$0xff]  ;;  %v996_v5 = vld [vmem:[#allocation7 + $0x48] sm:$0xff] }
  0xfd   :  { %1442 = vmatpush1.bf16.msra.mxu0 %v1441_v6  ;;  %694 = vmatprep.mubr.f32.mxu0 %v1623_v1  ;;  %v1446_v12 = vpack.c.bf16 %v805_v47, %v802_v11  ;;  %v1466_v6 = vpack.c.bf16 %v996_v5, %v993_v4 }
  0xfe   :  { %1443 = vmatprep.subr.bf16.mxu0 %v1626_v46 }
  0xff   :  { %1447 = vmatprep.subr.bf16.mxu1 %v1446_v12 }
 0x100   :  { %1221 = vmatmul.mubr.msk.f32.vlgmr.msra.gmra.mrb[0].mxu0 %vm626_vm6, %v619_v9  ;;  %1449 = vmatpush1.bf16.msra.mxu1 %v1448_v15 }
 0x101   :  { %1445 = vmatpush3.bf16.msra.mxu0 %v1444_v10  ;;  %1300 = vmatprep.mubr.msk.f32.mxu0 %vm1627_vm5, %v1623_v1 }
 0x102   :  { %1451 = vmatprep.subr.bf16.mxu1 %v1450_v18 }
 0x104   :  { %1301 = vmatmul.mubr.msk.f32.vlgmr.msra.gmra.mrb[6].mxu0 %vm626_vm6, %v619_v9  ;;  %1453 = vmatpush1.bf16.msra.mxu1 %v1452_v21 }
 0x105   :  { %1454 = vmatprep.subr.bf16.mxu1 %v1626_v46 }
 0x19a   :  { %v402_v22 = vpop.f32.mrb[0].mxu1 }
 0x19b   :  { %v1829_v23 = vpop.f32.mrb[1].mxu1 }
 0x1b4   :  { %v1831_v24 = vpop.f32.mrb[2].mxu0 }
 0x1b5   :  { %v1833_v25 = vpop.f32.mrb[3].mxu0 }
 0x1cf   :  { %v1835_v27 = vpop.f32.mrb[4].mxu0 }
 0x1d0   :  { %v1295_v28 = vpop.f32.mrb[5].mxu0 }
 0x1d1   :  { %v989_v28 = vld [vmem:[#allocation7 + $0x10] sm:$0xff] }
 0x1d3   :  { %v696_v29 = vpop.f32.mrb[0].mxu0 }
 0x1d4   :  { %v1223_v30 = vmul.f32 -1.442695, %v696_v29  ;;  %v698_v31 = vpop.f32.mrb[1].mxu0  ;;  %v992_v29 = vld [vmem:[#allocation7 + $0x28] sm:$0xff] }
 0x1d5   :  { %v1224_v34 = vmul.f32 -1.442695, %v698_v31 }
 0x1d6   :  { %1491 = vpow2.f32 %v1223_v30 }
 0x1d7   :  { %v767_v32 = vpop.f32.mrb[6].mxu0  ;;  %1493 = vpow2.f32 %v1224_v34  ;;  %v995_v34 = vld [vmem:[#allocation7 + $0x40] sm:$0xff] }
 0x1d8   :  { %v1302_v33 = vpop.f32.mrb[7].mxu0  ;;  %v792_v39 = vadd.f32 %v1225_v37, %v767_v32  ;;  %v1469_v32 = vpack.c.bf16 %v992_v29, %v989_v28 }
 0x1e0   :  { %v1492_v35 = vpop.eup %1491 }
 0x1e1   :  { %v775_v36 = vadd.f32 1.0, %v1492_v35  ;;  %v1494_v38 = vpop.eup %1493  ;;  %v998_v35 = vld [vmem:[#allocation7 + $0x58] sm:$0xff] }
 0x1e2   :  { %v782_v42 = vadd.f32 1.0, %v1494_v38 }
 0x1e3   :  { %1495 = vrcp.f32 %v775_v36 }
 0x1ed   :  { %v1496_v40 = vpop.eup %1495 }
 0x1ee   :  { %v793_v41 = vmul.f32 %v1496_v40, %v402_v22 }
 0x1f0   :  { %v794_v43 = vadd.f32 %v793_v41, %v792_v39 }
 0x1f2   :  { %1497 = vtanh.f32 %v794_v43 }
 0x1f3   :  { %1499 = vrcp.f32 %v782_v42 }
 0x1fc   :  { %v1498_v44 = vpop.eup %1497 }
 0x1fd   :  { %v796_v45 = vsub.f32 %v1788_v26, %v1498_v44  ;;  %v1500_v50 = vpop.eup %1499  ;;  %v988_v26 = vld [vmem:[#allocation7 + $0x8] sm:$0xff] }
 0x1fe   :  { %v1460_v58 = vpack.c.bf16 %v991_v57, %v988_v26  ;;  %v1239_v26 = vld [vmem:[#allocation2] ss:$0 sm:$0xff] }
 0x1ff   :  { %v797_v51 = vmul.f32 %v1500_v50, %v796_v45 }
 0x201   :  { %v798_v53 = vadd.f32 %v1498_v44, %v797_v51 }
 0x203   :  { %1226 = vmatmul.mubr.msk.f32.vlgmr.msra.gmra.mrb[4].mxu1 %vm110_vm1, %v798_v53  ;;  %800 = vst.msk [vmem:[%s1896_s12] sm:$0x3] %vm799_vm7, %v798_v53 }
 0x204   :  { %1456 = vmatpush3.bf16.msra.mxu1 %v1455_v52  ;;  %1311 = vmatprep.mubr.msk.f32.mxu1 %vm1627_vm5, %v1623_v1 }
 0x205   :  { %1457 = vmatprep.subr.bf16.mxu1 %v1626_v46 }
 0x208   :  { %1459 = vmatpush3.bf16.msra.mxu1 %v1458_v56 }
 0x209   :  { %1461 = vmatprep.subr.bf16.mxu1 %v1460_v58 }
 0x20b   :  { %1312 = vmatmul.mubr.msk.f32.vlgmr.msra.gmra.mrb[6].mxu1 %vm110_vm1, %v798_v53 }
 0x20c   :  { %1066 = vmatprep.mubr.f32.mxu1 %v1623_v1  ;;  %1463 = vmatpush1.bf16.msra.mxu1 %v1462_v61 }
 0x20d   :  { %1465 = vmatprep.subr.bf16.mxu1 %v1464_v0 }
 0x210   :  { %1467 = vmatpush1.bf16.msra.mxu1 %v1466_v6 }
 0x211   :  { %1468 = vmatprep.subr.bf16.mxu1 %v1626_v46 }
 0x2d6   :  { %v882_v7 = vpop.f32.mrb[4].mxu1 }
 0x2d7   :  { %v957_v8 = vadd.f32 %v882_v7, %v1829_v23  ;;  %v884_v9 = vpop.f32.mrb[5].mxu1 }
 0x2d8   :  { %v964_v10 = vadd.f32 %v884_v9, %v1831_v24 }
 0x2d9   :  { %v1228_v11 = vmul.f32 -1.442695, %v957_v8 }
 0x2da   :  { %v1229_v13 = vmul.f32 -1.442695, %v964_v10 }
 0x2db   :  { %1501 = vpow2.f32 %v1228_v11 }
 0x2dc   :  { %1503 = vpow2.f32 %v1229_v13 }
 0x2de   :  { %v953_v47 = vpop.f32.mrb[6].mxu1 }
 0x2df   :  { %v1313_v12 = vpop.f32.mrb[7].mxu1  ;;  %v978_v19 = vadd.f32 %v1230_v16, %v953_v47 }
 0x2e5   :  { %v1502_v14 = vpop.eup %1501 }
 0x2e6   :  { %v961_v15 = vadd.f32 1.0, %v1502_v14  ;;  %v1504_v17 = vpop.eup %1503 }
 0x2e7   :  { %v968_v21 = vadd.f32 1.0, %v1504_v17 }
 0x2e8   :  { %1505 = vrcp.f32 %v961_v15 }
 0x2f2   :  { %v1506_v18 = vpop.eup %1505 }
 0x2f3   :  { %v979_v20 = vmul.f32 %v1506_v18, %v1833_v25  ;;  %v1472_v25 = vpack.c.bf16 %v998_v35, %v995_v34 }
 0x2f5   :  { %v980_v22 = vadd.f32 %v979_v20, %v978_v19 }
 0x2f7   :  { %1507 = vtanh.f32 %v980_v22 }
 0x2f8   :  { %1509 = vrcp.f32 %v968_v21 }
 0x301   :  { %v1508_v23 = vpop.eup %1507 }
 0x302   :  { %v982_v24 = vsub.f32 %v1772_v2, %v1508_v23  ;;  %v1510_v30 = vpop.eup %1509 }
 0x304   :  { %v983_v31 = vmul.f32 %v1510_v30, %v982_v24 }
 0x306   :  { %v984_v33 = vadd.f32 %v1508_v23, %v983_v31 }
 0x308   :  { %1232 = vmatmul.mubr.msk.f32.vlgmr.msra.gmra.mrb[2].mxu1 %vm110_vm1, %v984_v33  ;;  %1231 = vst.msk [vmem:[%s1896_s12 + $0x2] sm:$0x3] %vm799_vm7, %v984_v33 }
 0x309   :  { %1470 = vmatpush3.bf16.msra.mxu1 %v1469_v32  ;;  %1322 = vmatprep.mubr.msk.f32.mxu1 %vm1627_vm5, %v1623_v1  ;;  %v1236_v1 = vld [vmem:[%s1891_s7] ss:$0 sm:$0xff] }
 0x30a   :  { %1471 = vmatprep.subr.bf16.mxu1 %v1626_v46 }
 0x30d   :  { %1473 = vmatpush3.bf16.msra.mxu1 %v1472_v25 }
 0x310   :  { %1323 = vmatmul.mubr.msk.f32.vlgmr.msra.gmra.mrb[8].mxu1 %vm110_vm1, %v984_v33 }
 0x3db   :  { %v1068_v2 = vpop.f32.mrb[2].mxu1 }
 0x3dc   :  { %v1234_v36 = vmul.f32 -1.442695, %v1068_v2  ;;  %v1070_v37 = vpop.f32.mrb[3].mxu1 }
 0x3dd   :  { %v1235_v40 = vmul.f32 -1.442695, %v1070_v37 }
 0x3de   :  { %1511 = vpow2.f32 %v1234_v36 }
 0x3df   :  { %1513 = vpow2.f32 %v1235_v40 }
 0x3e3   :  { %v1139_v38 = vpop.f32.mrb[8].mxu1 }
 0x3e4   :  { %v1324_v39 = vpop.f32.mrb[9].mxu1  ;;  %v1164_v44 = vadd.f32 %v1236_v1, %v1139_v38 }
 0x3e8   :  { %v1512_v41 = vpop.eup %1511 }
 0x3e9   :  { %v1147_v42 = vadd.f32 1.0, %v1512_v41  ;;  %v1514_v43 = vpop.eup %1513 }
 0x3ea   :  { %v1154_v48 = vadd.f32 1.0, %v1514_v43 }
 0x3eb   :  { %1515 = vrcp.f32 %v1147_v42 }
 0x3f5   :  { %v1516_v46 = vpop.eup %1515 }
 0x3f6   :  { %v1165_v45 = vmul.f32 %v1516_v46, %v1835_v27 }
 0x3f8   :  { %v1166_v49 = vadd.f32 %v1165_v45, %v1164_v44 }
 0x3fa   :  { %1517 = vtanh.f32 %v1166_v49 }
 0x3fb   :  { %1519 = vrcp.f32 %v1154_v48 }
 0x404   :  { %v1518_v50 = vpop.eup %1517 }
 0x405   :  { %v1168_v51 = vsub.f32 %v1777_v3, %v1518_v50  ;;  %v1520_v52 = vpop.eup %1519 }
 0x407   :  { %v1169_v53 = vmul.f32 %v1520_v52, %v1168_v51 }
 0x409   :  { %v1170_v55 = vadd.f32 %v1518_v50, %v1169_v53 }
 0x40b   :  { %v1180_v56 = vmul.f32 %v1238_v54, %v1170_v55  ;;  %1237 = vst.msk [vmem:[%s1896_s12 + $0x4] sm:$0x3] %vm799_vm7, %v1170_v55 }
 0x40d   :  { %v1181_v27 = vsel %vm799_vm7, %v1180_v56, 0.0 }
 0x40e   :  { %1182 = vadd.xlane.f32.xlu1 %v1181_v27 }
 0x49b   :  { %v1183_v57 = vpop.xlane.xlu1 %1182 }
 0x49c   :  { %v1191_v3 = vadd.f32 %v1239_v26, %v1183_v57 }
 0x49e   :  { %1193 = vst.msk [vmem:[%s1895_s11] sm:$0x3] %vm1192_vm8, %v1191_v3 }
 0x49f   :  { %1202 = vsyncpa [#allocation4], 1 }
 0x4a0   :  { %1203 = vsyncpa [#allocation6], 1 }
 0x4a1   :  { %1204 = vsyncpa [#allocation9], 1 }

</bundles_post_ra>
